<compile_context>
chip_gen: v5e
topology: v5e:2x2
jax: 0.10.0
libtpu: 0.0.40
codegen_flags: <defaults>
</compile_context>

<pallas_src>
import functools

import jax
import jax.numpy as jnp
from jax.experimental import pallas as pl
from jax.experimental.pallas import tpu as pltpu


def resnet_fc_kernel(x_ref, mw_ref, mb_ref, w_ref, b_ref, out_ref, h_acc):
    """One (batch_tile, res_block) grid step.

    x_ref  : (TB, D)        f32   input tile (same block for every res-block step)
    mw_ref : (D, Hp)        bf16  map weight (pre-transposed, column-padded)
    mb_ref : (1, Hp)        f32   map bias (padded)
    w_ref  : (3, Hp, Hp)    bf16  this block's 3 weights (pre-transposed, padded)
    b_ref  : (3, 1, Hp)     f32   this block's 3 biases (padded)
    out_ref: (TB, Hp)       f32   output tile (resident across the block axis)
    h_acc  : (TB, Hp)       f32   VMEM scratch holding the running activation
    """
    blk = pl.program_id(1)
    inv_sqrt2 = jnp.float32(0.7071067811865476)

    # h = map(x), computed once per batch tile.
    @pl.when(blk == 0)
    def _():
        h_acc[...] = (
            jnp.dot(
                x_ref[...].astype(jnp.bfloat16),
                mw_ref[...],
                preferred_element_type=jnp.float32,
            )
            + mb_ref[...]
        )

    h = h_acc[...]
    z = h
    # 3 x (Linear + SiLU), inner loop unrolled (static).
    for layer in range(3):
        zz = (
            jnp.dot(
                z.astype(jnp.bfloat16),
                w_ref[layer],
                preferred_element_type=jnp.float32,
            )
            + b_ref[layer]
        )
        z = zz * jax.nn.sigmoid(zz)  # SiLU in f32 (EUP sigmoid)

    h = (h + z) * inv_sqrt2
    h_acc[...] = h

    @pl.when(blk == pl.num_programs(1) - 1)
    def _():
        out_ref[...] = h.astype(out_ref.dtype)


def resnet_fc_forward(x, map_w, map_b, res_w, res_b, *, num_res_blocks):
    """Shapes (PyTorch Linear weights already transposed to (in, out)):
       x: (B, D); map_w: (D, H); map_b: (H,)
       res_w: (num_res_blocks*3, H, H); res_b: (num_res_blocks*3, H)
    """
    B, D = x.shape
    H = map_w.shape[1]
    assert res_w.shape == (num_res_blocks * 3, H, H)
    assert res_b.shape == (num_res_blocks * 3, H)

    # --- lane-dense padding of the hidden dim (multiple of 128) ---
    Hp = max(128, ((H + 127) // 128) * 128)
    ph = Hp - H
    # Pad weight columns/rows and biases with zeros (exact), cast weights to bf16.
    mw = jnp.pad(map_w, ((0, 0), (0, ph))).astype(jnp.bfloat16)            # (D, Hp)
    mb = jnp.pad(map_b, (0, ph)).reshape(1, Hp).astype(jnp.float32)        # (1, Hp)
    rw = jnp.pad(res_w, ((0, 0), (0, ph), (0, ph))).astype(jnp.bfloat16)   # (3N, Hp, Hp)
    rb = (
        jnp.pad(res_b, ((0, 0), (0, ph)))
        .reshape(num_res_blocks * 3, 1, Hp)
        .astype(jnp.float32)
    )                                                                      # (3N, 1, Hp)
    xf = x.astype(jnp.float32)  # x is NOT lane-padded (D stays as-is; one-time map cost)

    # --- batch tiling: shard across TensorCores when B is large ---
    TB = 128 if (B % 128 == 0) else B
    grid = (B // TB, num_res_blocks)

    cost = pl.CostEstimate(
        flops=2 * B * Hp * (D + 3 * num_res_blocks * Hp),
        transcendentals=3 * num_res_blocks * B * Hp,
        bytes_accessed=(
            B * D * 4            # x
            + D * Hp * 2         # map weight (bf16)
            + Hp * 4             # map bias
            + num_res_blocks * 3 * Hp * Hp * 2   # res weights (bf16)
            + num_res_blocks * 3 * Hp * 4        # res biases
            + B * Hp * 4         # output
        ),
    )

    out_padded = pl.pallas_call(
        resnet_fc_kernel,
        out_shape=jax.ShapeDtypeStruct((B, Hp), jnp.float32),
        grid_spec=pltpu.PrefetchScalarGridSpec(
            num_scalar_prefetch=0,
            grid=grid,
            in_specs=[
                # x and map params: same block every step -> stay resident, no re-DMA.
                pl.BlockSpec((TB, D), lambda bi, blk: (bi, 0)),
                pl.BlockSpec((D, Hp), lambda bi, blk: (0, 0)),
                pl.BlockSpec((1, Hp), lambda bi, blk: (0, 0)),
                # Per-res-block weights/biases: pipelined (double-buffered) over blk.
                pl.BlockSpec((3, Hp, Hp), lambda bi, blk: (blk, 0, 0)),
                pl.BlockSpec((3, 1, Hp), lambda bi, blk: (blk, 0, 0)),
            ],
            out_specs=pl.BlockSpec((TB, Hp), lambda bi, blk: (bi, 0)),
            scratch_shapes=[pltpu.VMEM((TB, Hp), jnp.float32)],
        ),
        compiler_params=pltpu.CompilerParams(
            dimension_semantics=("parallel", "arbitrary"),
        ),
        cost_estimate=cost,
    )(xf, mw, mb, rw, rb)

    return out_padded[:, :H]


def reference_forward(x, map_w, map_b, res_w, res_b, num_res_blocks):
    """Pure-JAX f32 reference mirroring the PyTorch forward."""
    h = x @ map_w + map_b
    for blk in range(num_res_blocks):
        z = h
        for layer in range(3):
            idx = blk * 3 + layer
            zz = z @ res_w[idx] + res_b[idx]
            z = zz * jax.nn.sigmoid(zz)
        h = (h + z) / jnp.sqrt(2.0)
    return h


if __name__ == "__main__":
    # Small, forward-consistent shapes (hidden dim gets padded to 128 internally).
    B = 8
    DATA_DIM = 4
    HIDDEN_DIM = 32
    NUM_RES_BLOCKS = 2

    key = jax.random.PRNGKey(0)
    kx, kmw, kmb, krw, krb = jax.random.split(key, 5)

    x = jax.random.normal(kx, (B, DATA_DIM), dtype=jnp.float32)

    # PyTorch Linear weights are (out, in); stored pre-transposed to (in, out).
    map_w = jax.random.normal(kmw, (DATA_DIM, HIDDEN_DIM), dtype=jnp.float32) * 0.1
    map_b = jax.random.normal(kmb, (HIDDEN_DIM,), dtype=jnp.float32) * 0.1
    res_w = jax.random.normal(
        krw, (NUM_RES_BLOCKS * 3, HIDDEN_DIM, HIDDEN_DIM), dtype=jnp.float32) * 0.1
    res_b = jax.random.normal(
        krb, (NUM_RES_BLOCKS * 3, HIDDEN_DIM), dtype=jnp.float32) * 0.1

    out = resnet_fc_forward(
        x, map_w, map_b, res_w, res_b, num_res_blocks=NUM_RES_BLOCKS)
    out = jax.block_until_ready(out)

    ref = reference_forward(x, map_w, map_b, res_w, res_b, NUM_RES_BLOCKS)
    assert out.shape == (B, HIDDEN_DIM)
    # bf16 matmul operands with f32 accumulation -> compare to f32 ref at relaxed tolerance.
    assert jnp.allclose(out, ref, atol=2e-2, rtol=2e-2), (
        "mismatch vs reference, max abs diff = "
        f"{float(jnp.max(jnp.abs(out - ref)))}"
    )

    print("KERNEL_OK")
</pallas_src>

<mosaic_0001>
module attributes {stable_mosaic.version = 11 : i64} {
  func.func @resnet_fc_kernel(%arg0: i32, %arg1: i32, %arg2: memref<8x4xf32, #tpu.memory_space<vmem>>, %arg3: memref<4x128xbf16, #tpu.memory_space<vmem>>, %arg4: memref<1x128xf32, #tpu.memory_space<vmem>>, %arg5: memref<3x128x128xbf16, #tpu.memory_space<vmem>>, %arg6: memref<3x1x128xf32, #tpu.memory_space<vmem>>, %arg7: memref<8x128xf32, #tpu.memory_space<vmem>>, %arg8: memref<8x128xf32, #tpu.memory_space<vmem>>) attributes {dimension_semantics = [#tpu.dimension_semantics<parallel>, #tpu.dimension_semantics<arbitrary>], iteration_bounds = array<i64: 1, 2>, scalar_prefetch = 0 : i64, scratch_operands = 1 : i64, tpu.core_type = #tpu.core_type<tc>, window_params = [{transform_indices = @transform_0, window_bounds = array<i64: 8, 4>}, {pipeline_mode = #tpu.pipeline_mode<synchronous>, transform_indices = @transform_1, window_bounds = array<i64: 4, 128>}, {pipeline_mode = #tpu.pipeline_mode<synchronous>, transform_indices = @transform_2, window_bounds = array<i64: 1, 128>}, {transform_indices = @transform_3, window_bounds = array<i64: 3, 128, 128>}, {transform_indices = @transform_4, window_bounds = array<i64: 3, 1, 128>}, {transform_indices = @transform_5, window_bounds = array<i64: 8, 128>}]} {
    %c0_i32 = arith.constant 0 : i32
    %0 = arith.cmpi eq, %arg1, %c0_i32 : i32
    %1 = arith.extui %0 : i1 to i32
    %c0_i32_0 = arith.constant 0 : i32
    %2 = arith.cmpi ne, %1, %c0_i32_0 : i32
    scf.if %2 {
      %c0_27 = arith.constant 0 : index
      %c0_28 = arith.constant 0 : index
      %53 = vector.load %arg2[%c0_27, %c0_28] : memref<8x4xf32, #tpu.memory_space<vmem>>, vector<8x4xf32>
      %54 = arith.truncf %53 : vector<8x4xf32> to vector<8x4xbf16>
      %c0_29 = arith.constant 0 : index
      %c0_30 = arith.constant 0 : index
      %55 = vector.load %arg3[%c0_29, %c0_30] : memref<4x128xbf16, #tpu.memory_space<vmem>>, vector<4x128xbf16>
      %cst_31 = arith.constant dense<0.000000e+00> : vector<8x128xf32>
      %56 = tpu.matmul %54, %55, %cst_31 {dimension_numbers = #tpu.dot_dimension_numbers<[1], [0], [0], [1], [0, 0, 1, 1], [], []>} : vector<8x4xbf16>, vector<4x128xbf16>, vector<8x128xf32> -> vector<8x128xf32>
      %c0_32 = arith.constant 0 : index
      %c0_33 = arith.constant 0 : index
      %57 = vector.load %arg4[%c0_32, %c0_33] : memref<1x128xf32, #tpu.memory_space<vmem>>, vector<1x128xf32>
      %58 = vector.broadcast %57 : vector<1x128xf32> to vector<8x128xf32>
      %59 = arith.addf %56, %58 : vector<8x128xf32>
      %c0_34 = arith.constant 0 : index
      %c0_35 = arith.constant 0 : index
      %60 = vector.load %arg8[%c0_34, %c0_35] : memref<8x128xf32, #tpu.memory_space<vmem>>, vector<8x128xf32>
      tpu.vector_store %arg8[%c0_34, %c0_35], %59 {strides = array<i32>} : memref<8x128xf32, #tpu.memory_space<vmem>>, vector<8x128xf32>,
    } else {
    }
    %c0 = arith.constant 0 : index
    %c0_1 = arith.constant 0 : index
    %3 = vector.load %arg8[%c0, %c0_1] : memref<8x128xf32, #tpu.memory_space<vmem>>, vector<8x128xf32>
    %4 = arith.truncf %3 : vector<8x128xf32> to vector<8x128xbf16>
    %c0_2 = arith.constant 0 : index
    %c0_3 = arith.constant 0 : index
    %c0_4 = arith.constant 0 : index
    %5 = vector.load %arg5[%c0_2, %c0_3, %c0_4] : memref<3x128x128xbf16, #tpu.memory_space<vmem>>, vector<1x128x128xbf16>
    %6 = vector.shape_cast %5 : vector<1x128x128xbf16> to vector<128x128xbf16>
    %cst = arith.constant dense<0.000000e+00> : vector<8x128xf32>
    %7 = tpu.matmul %4, %6, %cst {dimension_numbers = #tpu.dot_dimension_numbers<[1], [0], [0], [1], [0, 0, 1, 1], [], []>} : vector<8x128xbf16>, vector<128x128xbf16>, vector<8x128xf32> -> vector<8x128xf32>
    %c0_5 = arith.constant 0 : index
    %c0_6 = arith.constant 0 : index
    %c0_7 = arith.constant 0 : index
    %8 = vector.load %arg6[%c0_5, %c0_6, %c0_7] : memref<3x1x128xf32, #tpu.memory_space<vmem>>, vector<1x1x128xf32>
    %9 = vector.shape_cast %8 : vector<1x1x128xf32> to vector<1x128xf32>
    %10 = vector.broadcast %9 : vector<1x128xf32> to vector<8x128xf32>
    %11 = arith.addf %7, %10 : vector<8x128xf32>
    %12 = arith.negf %11 : vector<8x128xf32>
    %13 = math.exp %12 : vector<8x128xf32>
    %cst_8 = arith.constant 1.000000e+00 : f32
    %14 = vector.broadcast %cst_8 : f32 to vector<8x128xf32>
    %15 = arith.addf %14, %13 : vector<8x128xf32>
    %16 = arith.divf %14, %15 : vector<8x128xf32>
    %17 = arith.mulf %11, %16 : vector<8x128xf32>
    %18 = arith.truncf %17 : vector<8x128xf32> to vector<8x128xbf16>
    %c1 = arith.constant 1 : index
    %c0_9 = arith.constant 0 : index
    %c0_10 = arith.constant 0 : index
    %19 = vector.load %arg5[%c1, %c0_9, %c0_10] : memref<3x128x128xbf16, #tpu.memory_space<vmem>>, vector<1x128x128xbf16>
    %20 = vector.shape_cast %19 : vector<1x128x128xbf16> to vector<128x128xbf16>
    %cst_11 = arith.constant dense<0.000000e+00> : vector<8x128xf32>
    %21 = tpu.matmul %18, %20, %cst_11 {dimension_numbers = #tpu.dot_dimension_numbers<[1], [0], [0], [1], [0, 0, 1, 1], [], []>} : vector<8x128xbf16>, vector<128x128xbf16>, vector<8x128xf32> -> vector<8x128xf32>
    %c1_12 = arith.constant 1 : index
    %c0_13 = arith.constant 0 : index
    %c0_14 = arith.constant 0 : index
    %22 = vector.load %arg6[%c1_12, %c0_13, %c0_14] : memref<3x1x128xf32, #tpu.memory_space<vmem>>, vector<1x1x128xf32>
    %23 = vector.shape_cast %22 : vector<1x1x128xf32> to vector<1x128xf32>
    %24 = vector.broadcast %23 : vector<1x128xf32> to vector<8x128xf32>
    %25 = arith.addf %21, %24 : vector<8x128xf32>
    %26 = arith.negf %25 : vector<8x128xf32>
    %27 = math.exp %26 : vector<8x128xf32>
    %cst_15 = arith.constant 1.000000e+00 : f32
    %28 = vector.broadcast %cst_15 : f32 to vector<8x128xf32>
    %29 = arith.addf %28, %27 : vector<8x128xf32>
    %30 = arith.divf %28, %29 : vector<8x128xf32>
    %31 = arith.mulf %25, %30 : vector<8x128xf32>
    %32 = arith.truncf %31 : vector<8x128xf32> to vector<8x128xbf16>
    %c2 = arith.constant 2 : index
    %c0_16 = arith.constant 0 : index
    %c0_17 = arith.constant 0 : index
    %33 = vector.load %arg5[%c2, %c0_16, %c0_17] : memref<3x128x128xbf16, #tpu.memory_space<vmem>>, vector<1x128x128xbf16>
    %34 = vector.shape_cast %33 : vector<1x128x128xbf16> to vector<128x128xbf16>
    %cst_18 = arith.constant dense<0.000000e+00> : vector<8x128xf32>
    %35 = tpu.matmul %32, %34, %cst_18 {dimension_numbers = #tpu.dot_dimension_numbers<[1], [0], [0], [1], [0, 0, 1, 1], [], []>} : vector<8x128xbf16>, vector<128x128xbf16>, vector<8x128xf32> -> vector<8x128xf32>
    %c2_19 = arith.constant 2 : index
    %c0_20 = arith.constant 0 : index
    %c0_21 = arith.constant 0 : index
    %36 = vector.load %arg6[%c2_19, %c0_20, %c0_21] : memref<3x1x128xf32, #tpu.memory_space<vmem>>, vector<1x1x128xf32>
    %37 = vector.shape_cast %36 : vector<1x1x128xf32> to vector<1x128xf32>
    %38 = vector.broadcast %37 : vector<1x128xf32> to vector<8x128xf32>
    %39 = arith.addf %35, %38 : vector<8x128xf32>
    %40 = arith.negf %39 : vector<8x128xf32>
    %41 = math.exp %40 : vector<8x128xf32>
    %cst_22 = arith.constant 1.000000e+00 : f32
    %42 = vector.broadcast %cst_22 : f32 to vector<8x128xf32>
    %43 = arith.addf %42, %41 : vector<8x128xf32>
    %44 = arith.divf %42, %43 : vector<8x128xf32>
    %45 = arith.mulf %39, %44 : vector<8x128xf32>
    %46 = arith.addf %3, %45 : vector<8x128xf32>
    %cst_23 = arith.constant 0.707106769 : f32
    %47 = vector.broadcast %cst_23 : f32 to vector<8x128xf32>
    %48 = arith.mulf %46, %47 : vector<8x128xf32>
    %c0_24 = arith.constant 0 : index
    %c0_25 = arith.constant 0 : index
    %49 = vector.load %arg8[%c0_24, %c0_25] : memref<8x128xf32, #tpu.memory_space<vmem>>, vector<8x128xf32>
    tpu.vector_store %arg8[%c0_24, %c0_25], %48 {strides = array<i32>} : memref<8x128xf32, #tpu.memory_space<vmem>>, vector<8x128xf32>,
    %c1_i32 = arith.constant 1 : i32
    %50 = arith.cmpi eq, %arg1, %c1_i32 : i32
    %51 = arith.extui %50 : i1 to i32
    %c0_i32_26 = arith.constant 0 : i32
    %52 = arith.cmpi ne, %51, %c0_i32_26 : i32
    scf.if %52 {
      %c0_27 = arith.constant 0 : index
      %c0_28 = arith.constant 0 : index
      %53 = vector.load %arg7[%c0_27, %c0_28] : memref<8x128xf32, #tpu.memory_space<vmem>>, vector<8x128xf32>
      tpu.vector_store %arg7[%c0_27, %c0_28], %48 {strides = array<i32>} : memref<8x128xf32, #tpu.memory_space<vmem>>, vector<8x128xf32>,
    } else {
    }
    return
  }
  func.func @transform_0(%arg0: i32, %arg1: i32) -> (i32, i32) {
    %c0_i32 = arith.constant 0 : i32
    %c0_i32_0 = arith.constant 0 : i32
    return %arg0, %c0_i32 : i32, i32
  }
  func.func @transform_1(%arg0: i32, %arg1: i32) -> (i32, i32) {
    %c0_i32 = arith.constant 0 : i32
    %c0_i32_0 = arith.constant 0 : i32
    %c0_i32_1 = arith.constant 0 : i32
    return %c0_i32, %c0_i32_0 : i32, i32
  }
  func.func @transform_2(%arg0: i32, %arg1: i32) -> (i32, i32) {
    %c0_i32 = arith.constant 0 : i32
    %c0_i32_0 = arith.constant 0 : i32
    %c0_i32_1 = arith.constant 0 : i32
    return %c0_i32, %c0_i32_0 : i32, i32
  }
  func.func @transform_3(%arg0: i32, %arg1: i32) -> (i32, i32, i32) {
    %c0_i32 = arith.constant 0 : i32
    %c0_i32_0 = arith.constant 0 : i32
    %c0_i32_1 = arith.constant 0 : i32
    return %arg1, %c0_i32, %c0_i32_0 : i32, i32, i32
  }
  func.func @transform_4(%arg0: i32, %arg1: i32) -> (i32, i32, i32) {
    %c0_i32 = arith.constant 0 : i32
    %c0_i32_0 = arith.constant 0 : i32
    %c0_i32_1 = arith.constant 0 : i32
    return %arg1, %c0_i32, %c0_i32_0 : i32, i32, i32
  }
  func.func @transform_5(%arg0: i32, %arg1: i32) -> (i32, i32) {
    %c0_i32 = arith.constant 0 : i32
    %c0_i32_0 = arith.constant 0 : i32
    return %arg0, %c0_i32 : i32, i32
  }
}

</mosaic_0001>

<bundles_post_ra>
// kernel: tpu_custom_call.1
= control target key start
LH: loop header
LB: loop body
LE: loop exit
PB: predicated region body
PF: predicated region fallthrough
CT: control target
= control target key end

     0   :  { %10 = vsyncpa [#allocation4], 0  ;;  %s1275_s0 = inlined_call_operand.vmem [shape: f32[8,4], index: 0, kind: input, shape index: {}]   ;;  %s1276_s1 = inlined_call_operand.vmem [shape: bf16[4,128], index: 1, kind: input, shape index: {}]   ;;  %s1277_s2 = inlined_call_operand.vmem [shape: f32[1,128], index: 2, kind: input, shape index: {}]   ;;  %s1278_s3 = inlined_call_operand.hbm [shape: bf16[6,128,128], index: 3, kind: input, shape index: {}]   ;;  %s1279_s4 = inlined_call_operand.vmem [shape: f32[6,1,128], index: 4, kind: input, shape index: {}]   ;;  %s1280_s5 = inlined_call_operand.hbm [shape: f32[8,128], index: 5, kind: output, shape index: {}]  }
   0x1   :  { %12 = vsyncpa [#allocation4 + $0x1], 0 }
   0x2   :  { %13 = vsyncpa [#allocation5], 0  ;;  %s1140_s18 = smov 0   ;;  %s1142_s19 = smov 0  }
   0x3   :  { %s1144_s20 = smov 0   ;;  %s1146_s21 = smov 0  }
   0x4   :  { %s1148_s22 = smov 0   ;;  %s1150_s23 = smov 0  }
   0x5 LB: > { %s737_s24 = sadd.s32 4294967295, %s1105_s23   ;;  %s28_s25 = sadd.s32 1, %s1101_s22  ;;  %s1105_s23 = sphi %s1150_s23, %s19_s23   ;;  %s1101_s22 = sphi %s1148_s22, %s1286_s22   ;;  %s1097_s21 = sphi %s1146_s21, %s1285_s21   ;;  %s1093_s20 = sphi %s1144_s20, %s1284_s20   ;;  %s1089_s19 = sphi %s1142_s19, %s1283_s19   ;;  %s1085_s18 = sphi %s1140_s18, %s1282_s18  }
   0x6   : > { %p29_p0 = scmp.ge.s32.totalorder %s28_s25, 2  ;;  %s106_s26 = sadd.s32 1, %s1093_s20 }
   0x7   : > { %p113_p1 = scmp.ne.s32.totalorder %s1093_s20, %s1089_s19  ;;  %p114_p2 = scmp.eq.s32.totalorder %s1105_s23, 0 }
   0x8   : > { %s1288_s25 = smov (%p29_p0, %s28_s25), 0  ;;  %p119_p4 = scmp.ne.s32.totalorder %s1089_s19, %s1085_s18 }
   0x9   : > { %p115_p3 = por %p114_p2, %p113_p1  ;;  %s103_s27 = ssub.s32 %s1101_s22, %s1288_s25 }
   0xa   : > { %p120_p5 = scmp.eq.s32.totalorder %s737_s24, 0  ;;  %p104_p6 = scmp.eq.s32.totalorder %s103_s27, 0 }
   0xb   : > { %p923_p8 = scmp.lt.s32.totalorder %s1105_s23, 2  ;;  %s208_s30 = sand.u32 1, %s1093_s20  }
   0xc   : > { %p1181_p7 = por %p120_p5, %p119_p4  ;;  %s910_s6 = smul.u32 192, %s1101_s22 }
   0xd   : > { %s1187_s29 = scalar_select %p104_p6, %s1093_s20, %s106_s26  }
   0xe   : > { %s911_s7 = smul.u32 192, %s208_s30  ;;  %s218_s10 = scalar_lea.hbm %s1278_s3, %s910_s6 }
   0xf   : > { %p920_p9 = pnand %p923_p8, %p115_p3  ;;  %s219_s11 = sshll.u32 %s218_s10, 4  ;;  %s220_s11 = int_to_ptr.hbm [resolvable:$true] %s219_s11 }
  0x10   : > { %s212_s12 = scalar_lea.vmem [#allocation3], %s911_s7  ;;  %s209_s14 = scalar_lea.sflag [#allocation4], %s208_s30 }
  0x11   : > { %s221_s13 = sshll.u32 %s212_s12, 4  ;;  %s1107_s15 = smov 64   ;;  %s222_s13 = int_to_ptr.vmem [resolvable:$true] %s221_s13 }
  0x12   : > { %s1108_s16 = smov 4   ;;  %p743_p10 = scmp.ge.s32.totalorder %s1105_s23, 1 }
  0x13   : > { %922 = dma.hbm_to_vmem [thread:$0]  (!%p920_p9), %s220_s11, 3072, %s222_s13, %s209_s14, %s1107_s15, %s1107_s15, %s1108_s16  }
  0x14   : > { %p237_p11 = scmp.lt.s32.totalorder %s1105_s23, 3 }
  0x16   : > { %p238_p12 = pnand %p743_p10, %p237_p11 }
  0x17   : > { %s243_s17 = sand.u32 (!%p238_p12), 1, %s1089_s19  }
  0x18   : > { %241 = sbr.rel (%p238_p12) target bundleno = 704 (0x2c0), region = 40  ;;  %s244_s26 = scalar_lea.sflag (!%p238_p12), [#allocation4], %s243_s17 }
  0x19   : > { %s912_s18 = smul.u32 (!%p238_p12), 192, %s243_s17 }
  0x1b   : > { %s1197_s27 = scalar_lea.vmem (!%p238_p12), [#allocation3], %s912_s18 }
  0x1d   : > { %1076 = dma.done.wait (%p1181_p7), %s244_s26, 3072  }
  0x1e   : > { %1078 = vsyncadd (%p1181_p7), %s244_s26, 4294964224  ;;  %s283_s30 = smul.u32 3, %s1097_s21  ;;  %p744_p0 = scmp.ne.s32.totalorder %s1097_s21, 0 }
  0x20   : > { %p284_p13 = scmp.lt.s32.totalorder %s283_s30, 5  ;;  %292 = sbr.rel (%p744_p0) target bundleno = 176 (0xb0), region = 48 }
  0x22   : > { %s1290_s30 = smov (!%p284_p13, %s283_s30), 5 }
  0x23   : > { %s1207_s8 = scalar_lea.vmem %s1279_s4, %s1290_s30 }
  0x25   : > { %v295_v0 = vld [vmem:[%s1276_s1] sm:$0x3]  ;;  %vm304_vm0 = vcmask 1041408   ;;  %vm300_vm1 = vcmask 31744  }
  0x26   : > { %v293_v1 = vld [vmem:[%s1275_s0] sm:$0xff]  ;;  %v306_v2 = vsel %vm304_vm0, %v295_v0, 0 }
  0x27   : > { %v294_v3 = vpack.c.bf16 %v293_v1, %v293_v1  ;;  %315 = vmatpush.bf16.msra.mxu0 %v306_v2  ;;  %v977_v4 = vld [vmem:[%s1277_s2] ss:$0 sm:$0xff] }
  0x2a   : > { %745 = vmatmul.msk.bf16.vlgmr.msra.gmra.mxu0 %vm300_vm1, %v294_v3 }
  0xa7   : > { %v317_v5 = vpop.f32.mrf.mxu0 }
  0xa8   : > { %v318_v6 = vadd.f32 %v977_v4, %v317_v5 }
  0xaa   : > { %321 = vst [vmem:[#allocation2] sm:$0xff] %v318_v6 }
  0xaf   : > { %v319_v7 = vpop.f32.mrf.mxu0 }
  0xb0 PF: > { %v893_v8 = vld [vmem:[%s1197_s27 + $0x38] sm:$0xff]  ;;  %v892_v9 = vld [vmem:[%s1197_s27 + $0x30] sm:$0xff]  ;;  %v891_v10 = vld [vmem:[%s1197_s27 + $0x28] sm:$0xff]  ;;  %p879_p1 = scmp.ne.s32.totalorder %s1097_s21, 1 }
  0xb1   : > { %392 = vmatpush.bf16.msra.mxu0 %v893_v8  ;;  %v890_v11 = vld [vmem:[%s1197_s27 + $0x20] sm:$0xff]  ;;  %v889_v12 = vld [vmem:[%s1197_s27 + $0x18] sm:$0xff]  ;;  %v888_v13 = vld [vmem:[%s1197_s27 + $0x10] sm:$0xff] }
  0xb2   : > { %v887_v14 = vld [vmem:[%s1197_s27 + $0x8] sm:$0xff]  ;;  %v886_v15 = vld [vmem:[%s1197_s27] sm:$0xff]  ;;  %v1227_v16 = vld [vmem:[#allocation2] sm:$0xff] }
  0xb3   : > { %v323_v17 = vpack.c.bf16 %v1227_v16, %v1227_v16  ;;  %v901_v18 = vld [vmem:[%s1197_s27 + $0x78] sm:$0xff]  ;;  %v900_v19 = vld [vmem:[%s1197_s27 + $0x70] sm:$0xff]  ;;  %v899_v20 = vld [vmem:[%s1197_s27 + $0x68] sm:$0xff] }
  0xb4   : > { %496 = vmatpush.bf16.msra.mxu1 %v901_v18  ;;  %v898_v21 = vld [vmem:[%s1197_s27 + $0x60] sm:$0xff]  ;;  %v897_v22 = vld [vmem:[%s1197_s27 + $0x58] sm:$0xff]  ;;  %v896_v23 = vld [vmem:[%s1197_s27 + $0x50] sm:$0xff] }
  0xb5   : > { %393 = vmatpush.bf16.msra.mxu0 %v892_v9  ;;  %v895_v24 = vld [vmem:[%s1197_s27 + $0x48] sm:$0xff]  ;;  %v894_v25 = vld [vmem:[%s1197_s27 + $0x40] sm:$0xff]  ;;  %v978_v26 = vld [vmem:[%s1207_s8] ss:$0 sm:$0xff] }
  0xb6   : > { %v909_v45 = vld [vmem:[%s1197_s27 + $0xb8] sm:$0xff]  ;;  %v908_v46 = vld [vmem:[%s1197_s27 + $0xb0] sm:$0xff]  ;;  %v907_v47 = vld [vmem:[%s1197_s27 + $0xa8] sm:$0xff] }
  0xb7   : > { %600 = vmatpush.bf16.msra.mxu2 %v909_v45  ;;  %v906_v48 = vld [vmem:[%s1197_s27 + $0xa0] sm:$0xff]  ;;  %v905_v49 = vld [vmem:[%s1197_s27 + $0x98] sm:$0xff]  ;;  %v904_v50 = vld [vmem:[%s1197_s27 + $0x90] sm:$0xff] }
  0xb8   : > { %497 = vmatpush.bf16.msra.mxu1 %v900_v19  ;;  %v903_v51 = vld [vmem:[%s1197_s27 + $0x88] sm:$0xff]  ;;  %v902_v52 = vld [vmem:[%s1197_s27 + $0x80] sm:$0xff]  ;;  %v979_v53 = vld [vmem:[%s1207_s8 + $0x1] ss:$0 sm:$0xff] }
  0xb9   : > { %394 = vmatpush.bf16.msra.mxu0 %v891_v10  ;;  %v980_v8 = vld [vmem:[%s1207_s8 + $0x2] ss:$0 sm:$0xff] }
  0xbb   : > { %601 = vmatpush.bf16.msra.mxu2 %v908_v46 }
  0xbc   : > { %498 = vmatpush.bf16.msra.mxu1 %v899_v20 }
  0xbd   : > { %395 = vmatpush.bf16.msra.mxu0 %v890_v11 }
  0xbf   : > { %602 = vmatpush.bf16.msra.mxu2 %v907_v47 }
  0xc0   : > { %499 = vmatpush.bf16.msra.mxu1 %v898_v21 }
  0xc1   : > { %396 = vmatpush.bf16.msra.mxu0 %v889_v12 }
  0xc3   : > { %603 = vmatpush.bf16.msra.mxu2 %v906_v48 }
  0xc4   : > { %500 = vmatpush.bf16.msra.mxu1 %v897_v22 }
  0xc5   : > { %397 = vmatpush.bf16.msra.mxu0 %v888_v13 }
  0xc7   : > { %604 = vmatpush.bf16.msra.mxu2 %v905_v49 }
  0xc8   : > { %501 = vmatpush.bf16.msra.mxu1 %v896_v23 }
  0xc9   : > { %398 = vmatpush.bf16.msra.mxu0 %v887_v14 }
  0xcb   : > { %605 = vmatpush.bf16.msra.mxu2 %v904_v50 }
  0xcc   : > { %502 = vmatpush.bf16.msra.mxu1 %v895_v24 }
  0xcd   : > { %399 = vmatpush.bf16.msra.mxu0 %v886_v15 }
  0xcf   : > { %606 = vmatpush.bf16.msra.mxu2 %v903_v51 }
  0xd0   : > { %400 = vmatmul.bf16.vlgmr.msra.gmra.mxu0 %v323_v17  ;;  %503 = vmatpush.bf16.msra.mxu1 %v894_v25 }
  0xd3   : > { %607 = vmatpush.bf16.msra.mxu2 %v902_v52 }
 0x14d   : > { %v401_v27 = vpop.f32.mrf.mxu0 }
 0x14e   : > { %v402_v28 = vadd.f32 %v978_v26, %v401_v27 }
 0x150   : > { %v778_v29 = vmul.f32 -1.442695, %v402_v28 }
 0x152   : > { %981 = vpow2.f32 %v778_v29 }
 0x155   : > { %v403_v30 = vpop.f32.mrf.mxu0 }
 0x158   : > { %v982_v31 = vpop.eup %981 }
 0x159   : > { %v408_v32 = vadd.f32 1.0, %v982_v31 }
 0x15b   : > { %983 = vrcp.f32 %v408_v32  ;;  %v420_v36 = vand.u32 2147483648, %v408_v32  ;;  %v418_v38 = vand.u32 2147483647, %v408_v32  ;;  %vm414_vm3 = vweird.f32 %v408_v32 }
 0x15d   : > { %v421_v40 = vor.u32 1.1754944e-38, %v420_v36  ;;  %vm419_vm5 = vcmp.eq.f32.partialorder %v418_v38, 8.507059e+37 }
 0x161   : > { %v984_v33 = vpop.eup %983 }
 0x162   : > { %v410_v34 = vmul.f32 %v984_v33, %v408_v32  ;;  %vm415_vm2 = vweird.f32 %v984_v33 }
 0x163   : > { %vm416_vm4 = vmor %vm414_vm3, %vm415_vm2 }
 0x164   : > { %v411_v35 = vsub.f32 1.0, %v410_v34 }
 0x166   : > { %v412_v37 = vmul.f32 %v984_v33, %v411_v35 }
 0x168   : > { %v413_v39 = vadd.f32 %v984_v33, %v412_v37 }
 0x16a   : > { %v417_v41 = vsel %vm416_vm4, %v984_v33, %v413_v39 }
 0x16b   : > { %v422_v42 = vsel %vm419_vm5, %v421_v40, %v417_v41 }
 0x16c   : > { %v424_v43 = vmul.f32 %v422_v42, %v402_v28 }
 0x16e   : > { %v425_v44 = vpack.c.bf16 %v424_v43, %v424_v43 }
 0x170   : > { %504 = vmatmul.bf16.vlgmr.msra.gmra.mxu1 %v425_v44 }
 0x1ed   : > { %v505_v54 = vpop.f32.mrf.mxu1 }
 0x1ee   : > { %v506_v55 = vadd.f32 %v979_v53, %v505_v54 }
 0x1f0   : > { %v828_v56 = vmul.f32 -1.442695, %v506_v55 }
 0x1f2   : > { %985 = vpow2.f32 %v828_v56 }
 0x1f5   : > { %v507_v57 = vpop.f32.mrf.mxu1 }
 0x1f8   : > { %v986_v58 = vpop.eup %985 }
 0x1f9   : > { %v512_v59 = vadd.f32 1.0, %v986_v58 }
 0x1fb   : > { %987 = vrcp.f32 %v512_v59  ;;  %v524_v63 = vand.u32 2147483648, %v512_v59  ;;  %v522_v1 = vand.u32 2147483647, %v512_v59  ;;  %vm518_vm7 = vweird.f32 %v512_v59 }
 0x1fd   : > { %v525_v3 = vor.u32 1.1754944e-38, %v524_v63  ;;  %vm523_vm9 = vcmp.eq.f32.partialorder %v522_v1, 8.507059e+37 }
 0x201   : > { %v988_v60 = vpop.eup %987 }
 0x202   : > { %v514_v61 = vmul.f32 %v988_v60, %v512_v59  ;;  %vm519_vm6 = vweird.f32 %v988_v60 }
 0x203   : > { %vm520_vm8 = vmor %vm518_vm7, %vm519_vm6 }
 0x204   : > { %v515_v62 = vsub.f32 1.0, %v514_v61 }
 0x206   : > { %v516_v0 = vmul.f32 %v988_v60, %v515_v62 }
 0x208   : > { %v517_v2 = vadd.f32 %v988_v60, %v516_v0 }
 0x20a   : > { %v521_v4 = vsel %vm520_vm8, %v988_v60, %v517_v2 }
 0x20b   : > { %v526_v5 = vsel %vm523_vm9, %v525_v3, %v521_v4 }
 0x20c   : > { %v528_v6 = vmul.f32 %v526_v5, %v506_v55 }
 0x20e   : > { %v529_v7 = vpack.c.bf16 %v528_v6, %v528_v6 }
 0x210   : > { %608 = vmatmul.bf16.vlgmr.msra.gmra.mxu2 %v529_v7 }
 0x293   : > { %v609_v9 = vpop.f32.mrf.mxu2 }
 0x294   : > { %v610_v10 = vadd.f32 %v980_v8, %v609_v9 }
 0x296   : > { %v878_v11 = vmul.f32 -1.442695, %v610_v10 }
 0x298   : > { %989 = vpow2.f32 %v878_v11 }
 0x29b   : > { %v611_v12 = vpop.f32.mrf.mxu2 }
 0x29e   : > { %v990_v13 = vpop.eup %989 }
 0x29f   : > { %v616_v14 = vadd.f32 1.0, %v990_v13 }
 0x2a1   : > { %991 = vrcp.f32 %v616_v14  ;;  %v628_v19 = vand.u32 2147483648, %v616_v14  ;;  %v626_v21 = vand.u32 2147483647, %v616_v14  ;;  %vm622_vm11 = vweird.f32 %v616_v14 }
 0x2a3   : > { %v629_v23 = vor.u32 1.1754944e-38, %v628_v19  ;;  %vm627_vm13 = vcmp.eq.f32.partialorder %v626_v21, 8.507059e+37 }
 0x2a7   : > { %v992_v15 = vpop.eup %991 }
 0x2a8   : > { %v618_v17 = vmul.f32 %v992_v15, %v616_v14  ;;  %vm623_vm10 = vweird.f32 %v992_v15 }
 0x2a9   : > { %vm624_vm12 = vmor %vm622_vm11, %vm623_vm10 }
 0x2aa   : > { %v619_v18 = vsub.f32 1.0, %v618_v17 }
 0x2ac   : > { %v620_v20 = vmul.f32 %v992_v15, %v619_v18 }
 0x2ae   : > { %v621_v22 = vadd.f32 %v992_v15, %v620_v20 }
 0x2b0   : > { %v625_v24 = vsel %vm624_vm12, %v992_v15, %v621_v22 }
 0x2b1   : > { %v630_v25 = vsel %vm627_vm13, %v629_v23, %v625_v24 }
 0x2b2   : > { %v632_v26 = vmul.f32 %v630_v25, %v610_v10 }
 0x2b4   : > { %v633_v27 = vadd.f32 %v632_v26, %v1227_v16  ;;  %639 = sbr.rel (%p879_p1) target bundleno = 698 (0x2ba), region = 52 }
 0x2b6   : > { %v634_v28 = vmul.f32 0.70710677, %v633_v27 }
 0x2b8   : > { %635 = vst [vmem:[#allocation2] sm:$0xff] %v634_v28 }
 0x2b9   : > { %640 = vst [vmem:[#allocation6] sm:$0xff] %v634_v28 }
 0x2ba PF: > { %p924_p2 = scmp.eq.s32.totalorder %s737_s24, 1  ;;  %s651_s16 = sshll.u32 %s1280_s5, 4  ;;  %s652_s16 = int_to_ptr.hbm [resolvable:$true] %s651_s16 }
 0x2bb   : > { %s1109_s17 = smov [#allocation6]  }
 0x2bc   : > { %s649_s18 = sshll.u32 %s1109_s17, 4  ;;  %s650_s18 = int_to_ptr.vmem [resolvable:$true] %s649_s18 }
 0x2bd   : > { %916 = dma.vmem_to_hbm [thread:$0]  (%p924_p2), %s650_s18, 128, %s652_s16, [#allocation5]  }
 0x2be   : > { %1080 = dma.done.wait (%p924_p2), [#allocation5], 128  }
 0x2bf   : > { %1082 = vsyncadd (%p924_p2), [#allocation5], 4294967168 }
 0x2c0 PF: > { %s19_s23 = sadd.s32 1, %s1105_s23   ;;  %s1282_s18 = smov %s1089_s19 }
 0x2c1   : > { %p16_p3 = scmp.ge.s32.totalorder %s19_s23, 4   ;;  %s1283_s19 = smov %s1093_s20 }
 0x2c2   : > { %s1284_s20 = smov %s1187_s29  ;;  %s1285_s21 = smov %s1101_s22 }
 0x2c3   : > { %s1286_s22 = smov %s1288_s25  ;;  %18 = sbr.rel (!%p16_p3) target bundleno = 5 (0x5), region = 96 }
 0x2c8   :  { %665 = vsyncpa [#allocation4], 1 }
 0x2c9   :  { %667 = vsyncpa [#allocation4 + $0x1], 1 }
 0x2ca   :  { %668 = vsyncpa [#allocation5], 1 }
 0x2cb   :  { %670 = vsyncpa [#allocation5 + $0x1], 1 }

</bundles_post_ra>
